<compile_context>
chip_gen: v6e
topology: v6e:2x2x1
jax: 0.10.0
libtpu: 0.0.40
codegen_flags: <defaults>
</compile_context>

<pallas_src>
import functools

import jax
import jax.numpy as jnp
from jax.experimental import pallas as pl
from jax.experimental.pallas import tpu as pltpu

_LANE = 128
_SUBLANE = 8
_TARGET_TILE_BYTES = 2 * 1024 * 1024   # per input, per pipeline buffer


def _round_up(x, m):
    return ((x + m - 1) // m) * m


def _dice_kernel(yt_ref, yp_ref, out_ref, acc_prod, acc_lin, *,
                 smooth, rows, tile_rows, need_mask):
    i = pl.program_id(0)
    last = pl.num_programs(0) - 1

    @pl.when(i == 0)
    def _init():
        acc_prod[...] = jnp.zeros_like(acc_prod)
        acc_lin[...] = jnp.zeros_like(acc_lin)

    yt = yt_ref[...].astype(jnp.float32)
    yp = yp_ref[...].astype(jnp.float32)

    chunks = tile_rows // _SUBLANE

    def _accum(yt_v, yp_v):
        prod = yp_v * yt_v       # -> intersect = sum(y_pred * y_true)
        lin = yp_v + yt_v        # -> union     = sum(y_pred) + sum(y_true)
        # The reshape preserves (8,128) vreg tiling, so the axis-0 sum is a
        # chain of elementwise VPU adds (no cross-lane movement) that hides
        # under the input DMA.
        acc_prod[...] += prod.reshape(chunks, _SUBLANE, _LANE).sum(axis=0)
        acc_lin[...] += lin.reshape(chunks, _SUBLANE, _LANE).sum(axis=0)

    if need_mask:
        # Only the final (partial) tile overhangs the logical extent, so the
        # mask work is gated to that single step; full tiles take the fast path.
        @pl.when(i != last)
        def _full_tile():
            _accum(yt, yp)

        @pl.when(i == last)
        def _ragged_tile():
            row_ids = i * tile_rows + jax.lax.broadcasted_iota(
                jnp.int32, (tile_rows, 1), 0)
            valid = row_ids < rows
            # jnp.where (select, not multiply) so any undefined out-of-bounds
            # DMA fill cannot leak NaN/Inf into the sums.
            _accum(jnp.where(valid, yt, 0.0), jnp.where(valid, yp, 0.0))
    else:
        _accum(yt, yp)

    @pl.when(i == last)
    def _finalize():
        intersect = jnp.sum(acc_prod[...])
        union = jnp.sum(acc_lin[...])
        dice = (2.0 * intersect + smooth) / (union + smooth)
        out_ref[0, 0] = 1.0 - dice


def dice_loss(y_true, y_pred, smooth=0.01):
    """1 - (2*sum(y_pred*y_true) + smooth) / (sum(y_pred) + sum(y_true) + smooth)."""
    assert y_true.shape == y_pred.shape, "y_true and y_pred must have the same shape"

    n = int(y_true.size)

    yt = y_true.reshape(-1)
    yp = y_pred.reshape(-1)

    # Only pad the (at most 127-element) ragged lane tail; zeros are neutral
    # for both sums.  For the common case numel % 128 == 0 this is a pure
    # (free) reshape with no extra HBM traffic.
    lane_pad = (-n) % _LANE
    if lane_pad:
        yt = jnp.concatenate([yt, jnp.zeros((lane_pad,), yt.dtype)])
        yp = jnp.concatenate([yp, jnp.zeros((lane_pad,), yp.dtype)])

    rows = (n + lane_pad) // _LANE
    yt2 = yt.reshape(rows, _LANE)
    yp2 = yp.reshape(rows, _LANE)

    # Byte-budgeted row tiles: ~2 MiB per input per pipeline buffer (dtype
    # aware, so bf16 inputs stream twice the rows per step); clamp for small
    # inputs and keep the tile a multiple of the 8-row sublane.
    itemsize = max(jnp.dtype(yt2.dtype).itemsize, jnp.dtype(yp2.dtype).itemsize)
    max_tile_rows = max(
        _SUBLANE,
        (_TARGET_TILE_BYTES // (_LANE * itemsize)) // _SUBLANE * _SUBLANE,
    )
    tile_rows = min(max_tile_rows, _round_up(rows, _SUBLANE))
    num_steps = pl.cdiv(rows, tile_rows)
    need_mask = (rows % tile_rows) != 0

    out = pl.pallas_call(
        functools.partial(
            _dice_kernel,
            smooth=float(smooth),
            rows=rows,
            tile_rows=tile_rows,
            need_mask=need_mask,
        ),
        out_shape=jax.ShapeDtypeStruct((1, 1), jnp.float32),
        grid_spec=pltpu.PrefetchScalarGridSpec(
            num_scalar_prefetch=0,
            grid=(num_steps,),
            in_specs=[
                pl.BlockSpec((tile_rows, _LANE), lambda i: (i, 0)),
                pl.BlockSpec((tile_rows, _LANE), lambda i: (i, 0)),
            ],
            out_specs=pl.BlockSpec(memory_space=pltpu.SMEM),
            scratch_shapes=[
                pltpu.VMEM((_SUBLANE, _LANE), jnp.float32),   # running product sum
                pltpu.VMEM((_SUBLANE, _LANE), jnp.float32),   # running linear sum
            ],
        ),
        compiler_params=pltpu.CompilerParams(
            dimension_semantics=("arbitrary",),   # accumulator resident across grid
            vmem_limit_bytes=32 * 1024 * 1024,    # headroom: 2 inputs x 2 bufs x 2 MiB
        ),
    )(yt2, yp2)

    return out[0, 0]


def _ref_dice_loss(y_true, y_pred, smooth=0.01):
    intersect = jnp.sum(y_pred * y_true)
    union = jnp.sum(y_pred) + jnp.sum(y_true)
    return 1.0 - (2.0 * intersect + smooth) / (union + smooth)


if __name__ == "__main__":
    key = jax.random.PRNGKey(0)
    k1, k2, k3, k4 = jax.random.split(key, 4)

    # Small NCHW shapes consistent with a segmentation-style dice loss.
    shape = (2, 4, 16, 16)
    y_true = (jax.random.uniform(k1, shape) > 0.5).astype(jnp.float32)
    y_pred = jax.random.uniform(k2, shape, dtype=jnp.float32)

    loss = dice_loss(y_true, y_pred, smooth=0.01)
    loss = jax.block_until_ready(loss)
    ref = _ref_dice_loss(y_true, y_pred, smooth=0.01)
    assert jnp.allclose(loss, ref, rtol=1e-5, atol=1e-5), (loss, ref)

    # Second case with an awkward size to exercise the lane pad + row mask path.
    shape2 = (2, 3, 7, 9)
    y_true2 = (jax.random.uniform(k3, shape2) > 0.5).astype(jnp.float32)
    y_pred2 = jax.random.uniform(k4, shape2, dtype=jnp.float32)

    loss2 = dice_loss(y_true2, y_pred2, smooth=0.01)
    loss2 = jax.block_until_ready(loss2)
    ref2 = _ref_dice_loss(y_true2, y_pred2, smooth=0.01)
    assert jnp.allclose(loss2, ref2, rtol=1e-5, atol=1e-5), (loss2, ref2)

    print("KERNEL_OK")
</pallas_src>

<mosaic_0001>
module attributes {stable_mosaic.version = 11 : i64} {
  func.func @_dice_kernel(%arg0: i32, %arg1: memref<16x128xf32, #tpu.memory_space<vmem>>, %arg2: memref<16x128xf32, #tpu.memory_space<vmem>>, %arg3: memref<1x1xf32, #tpu.memory_space<smem>>, %arg4: memref<8x128xf32, #tpu.memory_space<vmem>>, %arg5: memref<8x128xf32, #tpu.memory_space<vmem>>) attributes {dimension_semantics = [#tpu.dimension_semantics<arbitrary>], iteration_bounds = array<i64: 1>, scalar_prefetch = 0 : i64, scratch_operands = 2 : i64, tpu.core_type = #tpu.core_type<tc>, window_params = [{transform_indices = @transform_0, window_bounds = array<i64: 16, 128>}, {transform_indices = @transform_1, window_bounds = array<i64: 16, 128>}, {transform_indices = @transform_2, window_bounds = array<i64: 1, 1>}]} {
    %c0_i32 = arith.constant 0 : i32
    %0 = arith.cmpi eq, %arg0, %c0_i32 : i32
    %1 = arith.extui %0 : i1 to i32
    %c0_i32_0 = arith.constant 0 : i32
    %2 = arith.cmpi ne, %1, %c0_i32_0 : i32
    scf.if %2 {
      %cst_15 = arith.constant 0.000000e+00 : f32
      %20 = vector.broadcast %cst_15 : f32 to vector<8x128xf32>
      %c0_16 = arith.constant 0 : index
      %c0_17 = arith.constant 0 : index
      %21 = vector.load %arg4[%c0_16, %c0_17] : memref<8x128xf32, #tpu.memory_space<vmem>>, vector<8x128xf32>
      tpu.vector_store %arg4[%c0_16, %c0_17], %20 {strides = array<i32>} : memref<8x128xf32, #tpu.memory_space<vmem>>, vector<8x128xf32>,
      %cst_18 = arith.constant 0.000000e+00 : f32
      %22 = vector.broadcast %cst_18 : f32 to vector<8x128xf32>
      %c0_19 = arith.constant 0 : index
      %c0_20 = arith.constant 0 : index
      %23 = vector.load %arg5[%c0_19, %c0_20] : memref<8x128xf32, #tpu.memory_space<vmem>>, vector<8x128xf32>
      tpu.vector_store %arg5[%c0_19, %c0_20], %22 {strides = array<i32>} : memref<8x128xf32, #tpu.memory_space<vmem>>, vector<8x128xf32>,
    } else {
    }
    %c0 = arith.constant 0 : index
    %c0_1 = arith.constant 0 : index
    %3 = vector.load %arg1[%c0, %c0_1] : memref<16x128xf32, #tpu.memory_space<vmem>>, vector<16x128xf32>
    %c0_2 = arith.constant 0 : index
    %c0_3 = arith.constant 0 : index
    %4 = vector.load %arg2[%c0_2, %c0_3] : memref<16x128xf32, #tpu.memory_space<vmem>>, vector<16x128xf32>
    %5 = arith.mulf %4, %3 : vector<16x128xf32>
    %6 = arith.addf %4, %3 : vector<16x128xf32>
    %c0_4 = arith.constant 0 : index
    %c0_5 = arith.constant 0 : index
    %7 = vector.load %arg4[%c0_4, %c0_5] : memref<8x128xf32, #tpu.memory_space<vmem>>, vector<8x128xf32>
    %8 = vector.shape_cast %5 : vector<16x128xf32> to vector<2x8x128xf32>
    %cst = arith.constant dense<0.000000e+00> : vector<8x128xf32>
    %9 = vector.multi_reduction <add>, %8, %cst [0] : vector<2x8x128xf32> to vector<8x128xf32>
    %10 = arith.addf %7, %9 : vector<8x128xf32>
    %c0_6 = arith.constant 0 : index
    %c0_7 = arith.constant 0 : index
    %11 = vector.load %arg4[%c0_6, %c0_7] : memref<8x128xf32, #tpu.memory_space<vmem>>, vector<8x128xf32>
    tpu.vector_store %arg4[%c0_6, %c0_7], %10 {strides = array<i32>} : memref<8x128xf32, #tpu.memory_space<vmem>>, vector<8x128xf32>,
    %c0_8 = arith.constant 0 : index
    %c0_9 = arith.constant 0 : index
    %12 = vector.load %arg5[%c0_8, %c0_9] : memref<8x128xf32, #tpu.memory_space<vmem>>, vector<8x128xf32>
    %13 = vector.shape_cast %6 : vector<16x128xf32> to vector<2x8x128xf32>
    %cst_10 = arith.constant dense<0.000000e+00> : vector<8x128xf32>
    %14 = vector.multi_reduction <add>, %13, %cst_10 [0] : vector<2x8x128xf32> to vector<8x128xf32>
    %15 = arith.addf %12, %14 : vector<8x128xf32>
    %c0_11 = arith.constant 0 : index
    %c0_12 = arith.constant 0 : index
    %16 = vector.load %arg5[%c0_11, %c0_12] : memref<8x128xf32, #tpu.memory_space<vmem>>, vector<8x128xf32>
    tpu.vector_store %arg5[%c0_11, %c0_12], %15 {strides = array<i32>} : memref<8x128xf32, #tpu.memory_space<vmem>>, vector<8x128xf32>,
    %c0_i32_13 = arith.constant 0 : i32
    %17 = arith.cmpi eq, %arg0, %c0_i32_13 : i32
    %18 = arith.extui %17 : i1 to i32
    %c0_i32_14 = arith.constant 0 : i32
    %19 = arith.cmpi ne, %18, %c0_i32_14 : i32
    scf.if %19 {
      %c0_15 = arith.constant 0 : index
      %c0_16 = arith.constant 0 : index
      %20 = vector.load %arg4[%c0_15, %c0_16] : memref<8x128xf32, #tpu.memory_space<vmem>>, vector<8x128xf32>
      %21 = vector.shape_cast %20 : vector<8x128xf32> to vector<1x8x128xf32>
      %cst_17 = arith.constant dense<0.000000e+00> : vector<1xf32>
      %22 = vector.multi_reduction <add>, %21, %cst_17 [1, 2] : vector<1x8x128xf32> to vector<1xf32>
      %23 = vector.shape_cast %22 : vector<1xf32> to vector<1x1x1xf32>
      %24 = vector.extract %23[0, 0, 0] : f32 from vector<1x1x1xf32>
      %c0_18 = arith.constant 0 : index
      %c0_19 = arith.constant 0 : index
      %25 = vector.load %arg5[%c0_18, %c0_19] : memref<8x128xf32, #tpu.memory_space<vmem>>, vector<8x128xf32>
      %26 = vector.shape_cast %25 : vector<8x128xf32> to vector<1x8x128xf32>
      %cst_20 = arith.constant dense<0.000000e+00> : vector<1xf32>
      %27 = vector.multi_reduction <add>, %26, %cst_20 [1, 2] : vector<1x8x128xf32> to vector<1xf32>
      %28 = vector.shape_cast %27 : vector<1xf32> to vector<1x1x1xf32>
      %29 = vector.extract %28[0, 0, 0] : f32 from vector<1x1x1xf32>
      %cst_21 = arith.constant 2.000000e+00 : f32
      %30 = arith.mulf %cst_21, %24 : f32
      %cst_22 = arith.constant 0.00999999977 : f32
      %31 = arith.addf %30, %cst_22 : f32
      %cst_23 = arith.constant 0.00999999977 : f32
      %32 = arith.addf %29, %cst_23 : f32
      %33 = arith.divf %31, %32 : f32
      %cst_24 = arith.constant 1.000000e+00 : f32
      %34 = arith.subf %cst_24, %33 : f32
      %c0_25 = arith.constant 0 : index
      %c0_26 = arith.constant 0 : index
      %35 = memref.load %arg3[%c0_25, %c0_26] : memref<1x1xf32, #tpu.memory_space<smem>>
      memref.store %34, %arg3[%c0_25, %c0_26] : memref<1x1xf32, #tpu.memory_space<smem>>
    } else {
    }
    return
  }
  func.func @transform_0(%arg0: i32) -> (i32, i32) {
    %c0_i32 = arith.constant 0 : i32
    %c0_i32_0 = arith.constant 0 : i32
    return %arg0, %c0_i32 : i32, i32
  }
  func.func @transform_1(%arg0: i32) -> (i32, i32) {
    %c0_i32 = arith.constant 0 : i32
    %c0_i32_0 = arith.constant 0 : i32
    return %arg0, %c0_i32 : i32, i32
  }
  func.func @transform_2(%arg0: i32) -> (i32, i32) {
    %c0_i32 = arith.constant 0 : i32
    %c0_i32_0 = arith.constant 0 : i32
    %c0_i32_1 = arith.constant 0 : i32
    return %c0_i32, %c0_i32_0 : i32, i32
  }
}

</mosaic_0001>

<bundles_post_ra>
// kernel: tpu_custom_call.1
= control target key start
LH: loop header
LB: loop body
LE: loop exit
PB: predicated region body
PF: predicated region fallthrough
CT: control target
= control target key end

     0   :  { %7 = vsyncpa [#allocation5], 0  ;;  %s206_s0 = inlined_call_operand.hbm [shape: f32[16,128], index: 0, kind: input, shape index: {}]   ;;  %s207_s1 = inlined_call_operand.hbm [shape: f32[16,128], index: 1, kind: input, shape index: {}]   ;;  %s208_s2 = inlined_call_operand.hbm [shape: f32[1,1], index: 2, kind: output, shape index: {}]  }
   0x1   :  { %8 = vsyncpa [#allocation8], 0 }
   0x2   :  { %9 = vsyncpa [#allocation6], 0  ;;  %s177_s9 = smov [#allocation4]  }
   0x3   :  { %s15_s10 = sshll.u32 %s177_s9, 4  ;;  %s16_s10 = int_to_ptr.vmem [resolvable:$true] %s15_s10 }
   0x4   :  { %s131_s11 = scalar_lea.vmem %s16_s10, 256  ;;  %p136_p1 = scmp.lt.s32.totalorder %s16_s10, %s16_s10 }
   0x5   :  { %p132_p0 = scmp.ne.s32.totalorder %s16_s10, %s131_s11  ;;  %p137_p2 = scmp.lt.s32.totalorder %s131_s11, %s131_s11 }
   0x7   :  { %p138_p3 = por %p137_p2, %p136_p1 }
   0x9   :  { %p139_p4 = pnand %p138_p3, %p132_p0 }
   0xb   :  { %142 = shalt.err (!%p139_p4)
}
   0xc   :  { %s178_s12 = smov 128   ;;  %s179_s13 = smov 8  }
   0xd   :  { %21 = dma.hbm_to_vmem [thread:$0]  %s206_s0, 256, %s16_s10, [#allocation5], %s178_s12, %s178_s12, %s179_s13  }
   0xe   :  { %s180_s16 = smov [#allocation7]  }
   0xf   :  { %s27_s17 = sshll.u32 %s180_s16, 4  ;;  %s28_s17 = int_to_ptr.vmem [resolvable:$true] %s27_s17 }
  0x10   :  { %s151_s18 = scalar_lea.vmem %s28_s17, 256  ;;  %p156_p6 = scmp.lt.s32.totalorder %s28_s17, %s28_s17 }
  0x11   :  { %p152_p5 = scmp.ne.s32.totalorder %s28_s17, %s151_s18  ;;  %p157_p7 = scmp.lt.s32.totalorder %s151_s18, %s151_s18 }
  0x13   :  { %p158_p8 = por %p157_p7, %p156_p6 }
  0x15   :  { %p159_p9 = pnand %p158_p8, %p152_p5 }
  0x17   :  { %162 = shalt.err (!%p159_p9)
}
  0x18   :  { %33 = dma.hbm_to_vmem [thread:$0]  %s207_s1, 256, %s28_s17, [#allocation8], %s178_s12, %s178_s12, %s179_s13  }
  0x19   :  { %171 = dma.done.wait [#allocation5], 256  }
  0x1a   :  { %172 = vsyncadd [#allocation5], 4294967040 }
  0x1b   :  { %173 = dma.done.wait [#allocation8], 256  }
  0x1c   :  { %174 = vsyncadd [#allocation8], 4294967040  ;;  %v46_v0 = vld [vmem:[#allocation4] sm:$0xff]  ;;  %v47_v1 = vld [vmem:[#allocation4 + $0x8] sm:$0xff]  ;;  %s181_s27 = smov [#allocation9]  }
  0x1d   :  { %v48_v2 = vld [vmem:[#allocation7] sm:$0xff]  ;;  %v49_v3 = vld [vmem:[#allocation7 + $0x8] sm:$0xff] }
  0x1e   :  { %v50_v4 = vmul.f32 %v48_v2, %v46_v0  ;;  %v51_v5 = vmul.f32 %v49_v3, %v47_v1  ;;  %v52_v6 = vadd.f32 %v48_v2, %v46_v0  ;;  %v53_v7 = vadd.f32 %v49_v3, %v47_v1 }
  0x20   :  { %v55_v8 = vadd.f32 %v51_v5, %v50_v4  ;;  %v59_v9 = vadd.f32 %v53_v7, %v52_v6 }
  0x22   :  { %66 = vadd.xlane.f32.xlu0 %v55_v8 }
  0x26   :  { %76 = vadd.xlane.f32.xlu0 %v59_v9 }
  0xab   :  { %v67_v10 = vpop.xlane.xlu0 %66 }
  0xac   :  { %v68_v11 = vrot.slane %v67_v10, 4 }
  0xae   :  { %v69_v12 = vadd.f32 %v68_v11, %v67_v10 }
  0xaf   :  { %v77_v13 = vpop.xlane.xlu0 %76 }
  0xb0   :  { %v70_v14 = vrot.slane %v69_v12, 2  ;;  %v78_v15 = vrot.slane %v77_v13, 4 }
  0xb2   :  { %v79_v16 = vadd.f32 %v78_v15, %v77_v13  ;;  %v71_v17 = vadd.f32 %v70_v14, %v69_v12 }
  0xb4   :  { %v80_v18 = vrot.slane %v79_v16, 2  ;;  %v72_v19 = vrot.slane %v71_v17, 1 }
  0xb6   :  { %v81_v20 = vadd.f32 %v80_v18, %v79_v16  ;;  %v73_v21 = vadd.f32 %v72_v19, %v71_v17 }
  0xb8   :  { %110 = vpush %v73_v21  ;;  %v82_v22 = vrot.slane %v81_v20, 1 }
  0xba   :  { %v83_v23 = vadd.f32 %v82_v22, %v81_v20 }
  0xbc   :  { %112 = vpush %v83_v23 }
  0xe9   :  { %s111_s0 = spop %110 }
  0xea   :  { %s85_s22 = smul.f32 2.0, %s111_s0 }
  0xec   :  { %s86_s23 = sadd.f32 0.01, %s85_s22 }
  0xed   :  { %s113_s1 = spop %112 }
  0xee   :  { %s87_s21 = sadd.f32 0.01, %s113_s1 }
  0xf0   :  { %v88_v24 = vstv %s87_s21 }
  0xf1   :  { %121 = vrcp.f32 %v88_v24 }
  0xfe   :  { %v122_v25 = vpop.eup %121 }
  0xff   :  { %114 = vpush %v122_v25 }
 0x130   :  { %s115_s24 = spop %114 }
 0x131   :  { %s91_s25 = smul.f32 %s115_s24, %s86_s23 }
 0x133   :  { %s92_s26 = ssub.f32 1.0, %s91_s25 }
 0x135   :  { %94 = sst [smem:[#allocation9]] %s92_s26 }
 0x136   :  { %102 = dma.smem_to_hbm %s181_s27, 16, %s208_s2, [#allocation6]  }
 0x137   :  { %175 = dma.done.wait [#allocation6], 16  }
 0x138   :  { %176 = vsyncadd [#allocation6], 4294967280 }
 0x139   :  { %106 = sfence }
 0x13a   :  { %107 = vsyncpa [#allocation5], 1 }
 0x13b   :  { %108 = vsyncpa [#allocation8], 1 }
 0x13c   :  { %109 = vsyncpa [#allocation6], 1 }

</bundles_post_ra>
